<compile_context>
chip_gen: v6e
topology: v6e:2x2x1
jax: 0.10.0
libtpu: 0.0.40
codegen_flags: <defaults>
</compile_context>

<pallas_src>
import functools

import jax
import jax.numpy as jnp
from jax import lax
from jax.experimental import pallas as pl
from jax.experimental.pallas import tpu as pltpu


def _mha_kernel(x_ref, wqkv_ref, wo_ref, bo_ref, o_ref, *, num_heads, head_size):
    # x_ref:    (Bt, T, C)   batch tile
    # wqkv_ref: (C, 3*D)     fused Q/K/V projection weights (grid-invariant)
    # wo_ref:   (D, C)       output projection weight
    # bo_ref:   (1, C)       output projection bias
    # o_ref:    (Bt, T, C)
    Bt, T, C = x_ref.shape
    D = num_heads * head_size
    in_dtype = x_ref.dtype
    scale = jnp.float32(head_size) ** jnp.float32(-0.5)

    # Fused QKV projection for all heads: one (Bt*T, C) @ (C, 3D) MXU pass.
    # Operands stay in input dtype (bf16-friendly); accumulate in f32.
    x2d = x_ref[...].reshape(Bt * T, C)                       # leading-dim collapse, no copy
    qkv = jnp.dot(x2d, wqkv_ref[...], preferred_element_type=jnp.float32)  # (Bt*T, 3D)

    # Fold 1/sqrt(head_size) into q (O(T*D) multiplies instead of O(T^2)).
    q = (qkv[:, 0:D] * scale).astype(in_dtype).reshape(Bt, T, D)
    k = qkv[:, D:2 * D].astype(in_dtype).reshape(Bt, T, D)
    v = qkv[:, 2 * D:3 * D].astype(in_dtype).reshape(Bt, T, D)

    # Causal additive bias (T, T), computed once and broadcast over batch and
    # heads.  Large finite negative (not -inf) so a fully-masked row would not
    # produce NaN through the softmax; one vadd per element instead of
    # compare+select per head.
    row = lax.broadcasted_iota(jnp.int32, (T, T), 0)
    col = lax.broadcasted_iota(jnp.int32, (T, T), 1)
    mask_bias = jnp.where(col <= row, jnp.float32(0.0), jnp.float32(-1e30))  # (T, T)

    # f32 accumulator, initialized with the (hoisted) broadcast output bias.
    out = jnp.broadcast_to(bo_ref[...].astype(jnp.float32), (Bt * T, C))

    for h in range(num_heads):                       # small, unrolled head loop
        lo = h * head_size
        hi = lo + head_size
        qh = q[:, :, lo:hi]                          # (Bt, T, Hd) static lane slice
        kh = k[:, :, lo:hi]
        vh = v[:, :, lo:hi]
        # Scores: contract last dims directly (batched over Bt).
        s = jnp.einsum('bqd,bkd->bqk', qh, kh,
                       preferred_element_type=jnp.float32)      # (Bt, T, T) f32
        s = s + mask_bias                                        # causal mask
        m = jnp.max(s, axis=-1, keepdims=True)
        p = jnp.exp(s - m)
        denom = jnp.sum(p, axis=-1, keepdims=True)
        p = p * pl.reciprocal(denom, approx=True)                # EUP slot, ~free
        # dropout on attention probs: identity (eval mode)
        head = jnp.einsum('bqk,bkd->bqd', p.astype(in_dtype), vh,
                          preferred_element_type=jnp.float32)    # (Bt, T, Hd)
        # Output projection distributed over heads (no lane-axis concat):
        #   concat(heads) @ W_o == sum_h head_h @ W_o[h*Hd:(h+1)*Hd, :]
        out = out + jnp.dot(head.reshape(Bt * T, head_size).astype(in_dtype),
                            wo_ref[lo:hi, :],
                            preferred_element_type=jnp.float32)

    # dropout on projected output: identity (eval mode)
    o_ref[...] = out.reshape(Bt, T, C).astype(o_ref.dtype)


def multi_head_attention(x, w_qkv, w_o, b_o, *, num_heads, head_size,
                         batch_tile=None):
    """x: (B, T, C); w_qkv: (C, 3*num_heads*head_size); w_o: (D, C); b_o: (C,).

    Returns (B, T, C) — equivalent to MultiHeadAttention.forward in eval mode.
    """
    B, T, C = x.shape
    D = num_heads * head_size
    assert w_qkv.shape == (C, 3 * D)
    assert w_o.shape == (D, C)
    b_o2d = b_o.reshape(1, C)

    if batch_tile is None:
        # Keep >= 2 grid steps when possible (v7x has 2 TensorCores) while
        # still giving each step Bt*T rows of matmul M.
        batch_tile = 2 if (B % 2 == 0 and B > 2) else (B if B <= 2 else 1)
    assert B % batch_tile == 0, "batch must be divisible by batch_tile"

    kernel = functools.partial(_mha_kernel, num_heads=num_heads,
                               head_size=head_size)
    return pl.pallas_call(
        kernel,
        out_shape=jax.ShapeDtypeStruct((B, T, C), x.dtype),
        grid_spec=pltpu.PrefetchScalarGridSpec(
            num_scalar_prefetch=0,
            grid=(B // batch_tile,),
            in_specs=[
                pl.BlockSpec((batch_tile, T, C), lambda b: (b, 0, 0)),   # x
                pl.BlockSpec((C, 3 * D), lambda b: (0, 0)),              # w_qkv (resident)
                pl.BlockSpec((D, C), lambda b: (0, 0)),                  # w_o   (resident)
                pl.BlockSpec((1, C), lambda b: (0, 0)),                  # b_o
            ],
            out_specs=pl.BlockSpec((batch_tile, T, C), lambda b: (b, 0, 0)),
        ),
        compiler_params=pltpu.CompilerParams(
            dimension_semantics=("parallel",)),
    )(x, w_qkv, w_o, b_o2d)


def _reference(x, w_q, w_k, w_v, w_o, b_o, num_heads, head_size):
    """Pure-JAX reference matching the PyTorch MultiHeadAttention (eval mode)."""
    q = x @ w_q
    k = x @ w_k
    v = x @ w_v
    T = x.shape[1]
    tril = jnp.tril(jnp.ones((T, T)))
    outs = []
    for h in range(num_heads):
        lo, hi = h * head_size, (h + 1) * head_size
        qh, kh, vh = q[..., lo:hi], k[..., lo:hi], v[..., lo:hi]
        wei = (qh @ jnp.swapaxes(kh, -2, -1)) * (head_size ** -0.5)
        wei = jnp.where(tril == 0, -jnp.inf, wei)
        wei = jax.nn.softmax(wei, axis=-1)
        outs.append(wei @ vh)
    out = jnp.concatenate(outs, axis=-1)
    return out @ w_o + b_o


if __name__ == "__main__":
    # Module hyperparameters — small but hardware-aligned (C = D = 128 lanes).
    num_heads = 4
    head_size = 32
    n_embed = num_heads * head_size   # 128
    block_size = 8
    dropout = 0.0                     # eval-mode dropout == identity

    B, T, C = 4, block_size, n_embed
    D = num_heads * head_size

    key = jax.random.PRNGKey(0)
    kx, kq, kk, kv, ko, kb = jax.random.split(key, 6)
    x = jax.random.normal(kx, (B, T, C), dtype=jnp.float32)
    # Deterministic synthetic parameters (not a checkpoint load).
    w_q = jax.random.normal(kq, (C, D), dtype=jnp.float32) * 0.1
    w_k = jax.random.normal(kk, (C, D), dtype=jnp.float32) * 0.1
    w_v = jax.random.normal(kv, (C, D), dtype=jnp.float32) * 0.1
    w_o = jax.random.normal(ko, (D, C), dtype=jnp.float32) * 0.1
    b_o = jax.random.normal(kb, (C,), dtype=jnp.float32) * 0.1

    w_qkv = jnp.concatenate([w_q, w_k, w_v], axis=1)   # (C, 3D) fused projection

    out = multi_head_attention(x, w_qkv, w_o, b_o,
                               num_heads=num_heads, head_size=head_size)
    out = jax.block_until_ready(out)

    ref = _reference(x, w_q, w_k, w_v, w_o, b_o, num_heads, head_size)
    assert out.shape == (B, T, C)
    # Tolerance loosened vs. exact math because the softmax denominator uses the
    # EUP approximate reciprocal (~1e-3 relative error).
    assert jnp.allclose(out, ref, atol=2e-2, rtol=2e-2), \
        float(jnp.max(jnp.abs(out - ref)))

    print("KERNEL_OK")
</pallas_src>

<mosaic_0001>
module attributes {stable_mosaic.version = 11 : i64} {
  func.func @_mha_kernel(%arg0: i32, %arg1: memref<2x8x128xf32, #tpu.memory_space<vmem>>, %arg2: memref<128x384xf32, #tpu.memory_space<vmem>>, %arg3: memref<128x128xf32, #tpu.memory_space<vmem>>, %arg4: memref<1x128xf32, #tpu.memory_space<vmem>>, %arg5: memref<2x8x128xf32, #tpu.memory_space<vmem>>) attributes {dimension_semantics = [#tpu.dimension_semantics<parallel>], iteration_bounds = array<i64: 2>, scalar_prefetch = 0 : i64, scratch_operands = 0 : i64, tpu.core_type = #tpu.core_type<tc>, window_params = [{transform_indices = @transform_0, window_bounds = array<i64: 2, 8, 128>}, {pipeline_mode = #tpu.pipeline_mode<synchronous>, transform_indices = @transform_1, window_bounds = array<i64: 128, 384>}, {pipeline_mode = #tpu.pipeline_mode<synchronous>, transform_indices = @transform_2, window_bounds = array<i64: 128, 128>}, {pipeline_mode = #tpu.pipeline_mode<synchronous>, transform_indices = @transform_3, window_bounds = array<i64: 1, 128>}, {transform_indices = @transform_4, window_bounds = array<i64: 2, 8, 128>}]} {
    %cst = arith.constant 3.200000e+01 : f32
    %cst_0 = arith.constant -5.000000e-01 : f32
    %0 = math.powf %cst, %cst_0 : f32
    %c0 = arith.constant 0 : index
    %c0_1 = arith.constant 0 : index
    %c0_2 = arith.constant 0 : index
    %1 = vector.load %arg1[%c0, %c0_1, %c0_2] : memref<2x8x128xf32, #tpu.memory_space<vmem>>, vector<2x8x128xf32>
    %2 = vector.shape_cast %1 : vector<2x8x128xf32> to vector<16x128xf32>
    %c0_3 = arith.constant 0 : index
    %c0_4 = arith.constant 0 : index
    %3 = vector.load %arg2[%c0_3, %c0_4] : memref<128x384xf32, #tpu.memory_space<vmem>>, vector<128x384xf32>
    %cst_5 = arith.constant dense<0.000000e+00> : vector<16x384xf32>
    %4 = tpu.matmul %2, %3, %cst_5 {dimension_numbers = #tpu.dot_dimension_numbers<[1], [0], [0], [1], [0, 0, 1, 1], [], []>} : vector<16x128xf32>, vector<128x384xf32>, vector<16x384xf32> -> vector<16x384xf32>
    %5 = vector.extract_strided_slice %4 {offsets = [0, 0], sizes = [16, 128], strides = [1, 1]} : vector<16x384xf32> to vector<16x128xf32>
    %6 = vector.broadcast %0 : f32 to vector<16x128xf32>
    %7 = arith.mulf %5, %6 : vector<16x128xf32>
    %8 = vector.shape_cast %7 : vector<16x128xf32> to vector<2x8x128xf32>
    %9 = vector.extract_strided_slice %4 {offsets = [0, 128], sizes = [16, 128], strides = [1, 1]} : vector<16x384xf32> to vector<16x128xf32>
    %10 = vector.shape_cast %9 : vector<16x128xf32> to vector<2x8x128xf32>
    %11 = vector.extract_strided_slice %4 {offsets = [0, 256], sizes = [16, 128], strides = [1, 1]} : vector<16x384xf32> to vector<16x128xf32>
    %12 = vector.shape_cast %11 : vector<16x128xf32> to vector<2x8x128xf32>
    %13 = tpu.iota {dimensions = array<i32: 0>} : vector<8x8xi32>
    %14 = tpu.iota {dimensions = array<i32: 1>} : vector<8x8xi32>
    %15 = arith.cmpi sle, %14, %13 : vector<8x8xi32>
    %cst_6 = arith.constant 0.000000e+00 : f32
    %cst_7 = arith.constant -1.000000e+30 : f32
    %16 = vector.broadcast %cst_6 : f32 to vector<8x8xf32>
    %17 = vector.broadcast %cst_7 : f32 to vector<8x8xf32>
    %18 = arith.select %15, %16, %17 : vector<8x8xi1>, vector<8x8xf32>
    %c0_8 = arith.constant 0 : index
    %c0_9 = arith.constant 0 : index
    %19 = vector.load %arg4[%c0_8, %c0_9] : memref<1x128xf32, #tpu.memory_space<vmem>>, vector<1x128xf32>
    %20 = vector.shape_cast %19 : vector<1x128xf32> to vector<1x128xf32>
    %21 = vector.broadcast %20 : vector<1x128xf32> to vector<16x128xf32>
    %22 = vector.extract_strided_slice %8 {offsets = [0, 0, 0], sizes = [2, 8, 32], strides = [1, 1, 1]} : vector<2x8x128xf32> to vector<2x8x32xf32>
    %23 = vector.extract_strided_slice %10 {offsets = [0, 0, 0], sizes = [2, 8, 32], strides = [1, 1, 1]} : vector<2x8x128xf32> to vector<2x8x32xf32>
    %24 = vector.extract_strided_slice %12 {offsets = [0, 0, 0], sizes = [2, 8, 32], strides = [1, 1, 1]} : vector<2x8x128xf32> to vector<2x8x32xf32>
    "tpu.trace_start"() <{level = 10 : i32, message = "bqd,bkd->bqk"}> : () -> ()
    %cst_10 = arith.constant dense<0.000000e+00> : vector<2x8x8xf32>
    %25 = tpu.matmul %22, %23, %cst_10 {dimension_numbers = #tpu.dot_dimension_numbers<[2], [2], [1], [1], [0, 0, 0, 1, 1, 1], [0], [0]>} : vector<2x8x32xf32>, vector<2x8x32xf32>, vector<2x8x8xf32> -> vector<2x8x8xf32>
    "tpu.trace_stop"() : () -> ()
    %26 = vector.shape_cast %18 : vector<8x8xf32> to vector<1x8x8xf32>
    %27 = vector.broadcast %26 : vector<1x8x8xf32> to vector<2x8x8xf32>
    %28 = arith.addf %25, %27 : vector<2x8x8xf32>
    %cst_11 = arith.constant dense<0xFF800000> : vector<2x8xf32>
    %29 = vector.multi_reduction <maximumf>, %28, %cst_11 [2] : vector<2x8x8xf32> to vector<2x8xf32>
    %30 = vector.shape_cast %29 : vector<2x8xf32> to vector<2x8x1xf32>
    %31 = vector.broadcast %30 : vector<2x8x1xf32> to vector<2x8x8xf32>
    %32 = arith.subf %28, %31 : vector<2x8x8xf32>
    %33 = math.exp %32 : vector<2x8x8xf32>
    %cst_12 = arith.constant dense<0.000000e+00> : vector<2x8xf32>
    %34 = vector.multi_reduction <add>, %33, %cst_12 [2] : vector<2x8x8xf32> to vector<2x8xf32>
    %35 = vector.shape_cast %34 : vector<2x8xf32> to vector<2x8x1xf32>
    %36 = tpu.reciprocal %35 {approx = true} : vector<2x8x1xf32> -> vector<2x8x1xf32>
    %37 = vector.broadcast %36 : vector<2x8x1xf32> to vector<2x8x8xf32>
    %38 = arith.mulf %33, %37 : vector<2x8x8xf32>
    "tpu.trace_start"() <{level = 10 : i32, message = "bqk,bkd->bqd"}> : () -> ()
    %cst_13 = arith.constant dense<0.000000e+00> : vector<2x8x32xf32>
    %39 = tpu.matmul %38, %24, %cst_13 {dimension_numbers = #tpu.dot_dimension_numbers<[2], [1], [1], [2], [0, 0, 0, 1, 1, 2], [0], [0]>} : vector<2x8x8xf32>, vector<2x8x32xf32>, vector<2x8x32xf32> -> vector<2x8x32xf32>
    "tpu.trace_stop"() : () -> ()
    %40 = vector.shape_cast %39 : vector<2x8x32xf32> to vector<16x32xf32>
    %c0_14 = arith.constant 0 : index
    %c0_15 = arith.constant 0 : index
    %41 = vector.load %arg3[%c0_14, %c0_15] : memref<128x128xf32, #tpu.memory_space<vmem>>, vector<32x128xf32>
    %cst_16 = arith.constant dense<0.000000e+00> : vector<16x128xf32>
    %42 = tpu.matmul %40, %41, %cst_16 {dimension_numbers = #tpu.dot_dimension_numbers<[1], [0], [0], [1], [0, 0, 1, 1], [], []>} : vector<16x32xf32>, vector<32x128xf32>, vector<16x128xf32> -> vector<16x128xf32>
    %43 = arith.addf %21, %42 : vector<16x128xf32>
    %44 = vector.extract_strided_slice %8 {offsets = [0, 0, 32], sizes = [2, 8, 32], strides = [1, 1, 1]} : vector<2x8x128xf32> to vector<2x8x32xf32>
    %45 = vector.extract_strided_slice %10 {offsets = [0, 0, 32], sizes = [2, 8, 32], strides = [1, 1, 1]} : vector<2x8x128xf32> to vector<2x8x32xf32>
    %46 = vector.extract_strided_slice %12 {offsets = [0, 0, 32], sizes = [2, 8, 32], strides = [1, 1, 1]} : vector<2x8x128xf32> to vector<2x8x32xf32>
    "tpu.trace_start"() <{level = 10 : i32, message = "bqd,bkd->bqk"}> : () -> ()
    %cst_17 = arith.constant dense<0.000000e+00> : vector<2x8x8xf32>
    %47 = tpu.matmul %44, %45, %cst_17 {dimension_numbers = #tpu.dot_dimension_numbers<[2], [2], [1], [1], [0, 0, 0, 1, 1, 1], [0], [0]>} : vector<2x8x32xf32>, vector<2x8x32xf32>, vector<2x8x8xf32> -> vector<2x8x8xf32>
    "tpu.trace_stop"() : () -> ()
    %48 = vector.shape_cast %18 : vector<8x8xf32> to vector<1x8x8xf32>
    %49 = vector.broadcast %48 : vector<1x8x8xf32> to vector<2x8x8xf32>
    %50 = arith.addf %47, %49 : vector<2x8x8xf32>
    %cst_18 = arith.constant dense<0xFF800000> : vector<2x8xf32>
    %51 = vector.multi_reduction <maximumf>, %50, %cst_18 [2] : vector<2x8x8xf32> to vector<2x8xf32>
    %52 = vector.shape_cast %51 : vector<2x8xf32> to vector<2x8x1xf32>
    %53 = vector.broadcast %52 : vector<2x8x1xf32> to vector<2x8x8xf32>
    %54 = arith.subf %50, %53 : vector<2x8x8xf32>
    %55 = math.exp %54 : vector<2x8x8xf32>
    %cst_19 = arith.constant dense<0.000000e+00> : vector<2x8xf32>
    %56 = vector.multi_reduction <add>, %55, %cst_19 [2] : vector<2x8x8xf32> to vector<2x8xf32>
    %57 = vector.shape_cast %56 : vector<2x8xf32> to vector<2x8x1xf32>
    %58 = tpu.reciprocal %57 {approx = true} : vector<2x8x1xf32> -> vector<2x8x1xf32>
    %59 = vector.broadcast %58 : vector<2x8x1xf32> to vector<2x8x8xf32>
    %60 = arith.mulf %55, %59 : vector<2x8x8xf32>
    "tpu.trace_start"() <{level = 10 : i32, message = "bqk,bkd->bqd"}> : () -> ()
    %cst_20 = arith.constant dense<0.000000e+00> : vector<2x8x32xf32>
    %61 = tpu.matmul %60, %46, %cst_20 {dimension_numbers = #tpu.dot_dimension_numbers<[2], [1], [1], [2], [0, 0, 0, 1, 1, 2], [0], [0]>} : vector<2x8x8xf32>, vector<2x8x32xf32>, vector<2x8x32xf32> -> vector<2x8x32xf32>
    "tpu.trace_stop"() : () -> ()
    %62 = vector.shape_cast %61 : vector<2x8x32xf32> to vector<16x32xf32>
    %c32 = arith.constant 32 : index
    %c0_21 = arith.constant 0 : index
    %63 = vector.load %arg3[%c32, %c0_21] : memref<128x128xf32, #tpu.memory_space<vmem>>, vector<32x128xf32>
    %cst_22 = arith.constant dense<0.000000e+00> : vector<16x128xf32>
    %64 = tpu.matmul %62, %63, %cst_22 {dimension_numbers = #tpu.dot_dimension_numbers<[1], [0], [0], [1], [0, 0, 1, 1], [], []>} : vector<16x32xf32>, vector<32x128xf32>, vector<16x128xf32> -> vector<16x128xf32>
    %65 = arith.addf %43, %64 : vector<16x128xf32>
    %66 = vector.extract_strided_slice %8 {offsets = [0, 0, 64], sizes = [2, 8, 32], strides = [1, 1, 1]} : vector<2x8x128xf32> to vector<2x8x32xf32>
    %67 = vector.extract_strided_slice %10 {offsets = [0, 0, 64], sizes = [2, 8, 32], strides = [1, 1, 1]} : vector<2x8x128xf32> to vector<2x8x32xf32>
    %68 = vector.extract_strided_slice %12 {offsets = [0, 0, 64], sizes = [2, 8, 32], strides = [1, 1, 1]} : vector<2x8x128xf32> to vector<2x8x32xf32>
    "tpu.trace_start"() <{level = 10 : i32, message = "bqd,bkd->bqk"}> : () -> ()
    %cst_23 = arith.constant dense<0.000000e+00> : vector<2x8x8xf32>
    %69 = tpu.matmul %66, %67, %cst_23 {dimension_numbers = #tpu.dot_dimension_numbers<[2], [2], [1], [1], [0, 0, 0, 1, 1, 1], [0], [0]>} : vector<2x8x32xf32>, vector<2x8x32xf32>, vector<2x8x8xf32> -> vector<2x8x8xf32>
    "tpu.trace_stop"() : () -> ()
    %70 = vector.shape_cast %18 : vector<8x8xf32> to vector<1x8x8xf32>
    %71 = vector.broadcast %70 : vector<1x8x8xf32> to vector<2x8x8xf32>
    %72 = arith.addf %69, %71 : vector<2x8x8xf32>
    %cst_24 = arith.constant dense<0xFF800000> : vector<2x8xf32>
    %73 = vector.multi_reduction <maximumf>, %72, %cst_24 [2] : vector<2x8x8xf32> to vector<2x8xf32>
    %74 = vector.shape_cast %73 : vector<2x8xf32> to vector<2x8x1xf32>
    %75 = vector.broadcast %74 : vector<2x8x1xf32> to vector<2x8x8xf32>
    %76 = arith.subf %72, %75 : vector<2x8x8xf32>
    %77 = math.exp %76 : vector<2x8x8xf32>
    %cst_25 = arith.constant dense<0.000000e+00> : vector<2x8xf32>
    %78 = vector.multi_reduction <add>, %77, %cst_25 [2] : vector<2x8x8xf32> to vector<2x8xf32>
    %79 = vector.shape_cast %78 : vector<2x8xf32> to vector<2x8x1xf32>
    %80 = tpu.reciprocal %79 {approx = true} : vector<2x8x1xf32> -> vector<2x8x1xf32>
    %81 = vector.broadcast %80 : vector<2x8x1xf32> to vector<2x8x8xf32>
    %82 = arith.mulf %77, %81 : vector<2x8x8xf32>
    "tpu.trace_start"() <{level = 10 : i32, message = "bqk,bkd->bqd"}> : () -> ()
    %cst_26 = arith.constant dense<0.000000e+00> : vector<2x8x32xf32>
    %83 = tpu.matmul %82, %68, %cst_26 {dimension_numbers = #tpu.dot_dimension_numbers<[2], [1], [1], [2], [0, 0, 0, 1, 1, 2], [0], [0]>} : vector<2x8x8xf32>, vector<2x8x32xf32>, vector<2x8x32xf32> -> vector<2x8x32xf32>
    "tpu.trace_stop"() : () -> ()
    %84 = vector.shape_cast %83 : vector<2x8x32xf32> to vector<16x32xf32>
    %c64 = arith.constant 64 : index
    %c0_27 = arith.constant 0 : index
    %85 = vector.load %arg3[%c64, %c0_27] : memref<128x128xf32, #tpu.memory_space<vmem>>, vector<32x128xf32>
    %cst_28 = arith.constant dense<0.000000e+00> : vector<16x128xf32>
    %86 = tpu.matmul %84, %85, %cst_28 {dimension_numbers = #tpu.dot_dimension_numbers<[1], [0], [0], [1], [0, 0, 1, 1], [], []>} : vector<16x32xf32>, vector<32x128xf32>, vector<16x128xf32> -> vector<16x128xf32>
    %87 = arith.addf %65, %86 : vector<16x128xf32>
    %88 = vector.extract_strided_slice %8 {offsets = [0, 0, 96], sizes = [2, 8, 32], strides = [1, 1, 1]} : vector<2x8x128xf32> to vector<2x8x32xf32>
    %89 = vector.extract_strided_slice %10 {offsets = [0, 0, 96], sizes = [2, 8, 32], strides = [1, 1, 1]} : vector<2x8x128xf32> to vector<2x8x32xf32>
    %90 = vector.extract_strided_slice %12 {offsets = [0, 0, 96], sizes = [2, 8, 32], strides = [1, 1, 1]} : vector<2x8x128xf32> to vector<2x8x32xf32>
    "tpu.trace_start"() <{level = 10 : i32, message = "bqd,bkd->bqk"}> : () -> ()
    %cst_29 = arith.constant dense<0.000000e+00> : vector<2x8x8xf32>
    %91 = tpu.matmul %88, %89, %cst_29 {dimension_numbers = #tpu.dot_dimension_numbers<[2], [2], [1], [1], [0, 0, 0, 1, 1, 1], [0], [0]>} : vector<2x8x32xf32>, vector<2x8x32xf32>, vector<2x8x8xf32> -> vector<2x8x8xf32>
    "tpu.trace_stop"() : () -> ()
    %92 = vector.shape_cast %18 : vector<8x8xf32> to vector<1x8x8xf32>
    %93 = vector.broadcast %92 : vector<1x8x8xf32> to vector<2x8x8xf32>
    %94 = arith.addf %91, %93 : vector<2x8x8xf32>
    %cst_30 = arith.constant dense<0xFF800000> : vector<2x8xf32>
    %95 = vector.multi_reduction <maximumf>, %94, %cst_30 [2] : vector<2x8x8xf32> to vector<2x8xf32>
    %96 = vector.shape_cast %95 : vector<2x8xf32> to vector<2x8x1xf32>
    %97 = vector.broadcast %96 : vector<2x8x1xf32> to vector<2x8x8xf32>
    %98 = arith.subf %94, %97 : vector<2x8x8xf32>
    %99 = math.exp %98 : vector<2x8x8xf32>
    %cst_31 = arith.constant dense<0.000000e+00> : vector<2x8xf32>
    %100 = vector.multi_reduction <add>, %99, %cst_31 [2] : vector<2x8x8xf32> to vector<2x8xf32>
    %101 = vector.shape_cast %100 : vector<2x8xf32> to vector<2x8x1xf32>
    %102 = tpu.reciprocal %101 {approx = true} : vector<2x8x1xf32> -> vector<2x8x1xf32>
    %103 = vector.broadcast %102 : vector<2x8x1xf32> to vector<2x8x8xf32>
    %104 = arith.mulf %99, %103 : vector<2x8x8xf32>
    "tpu.trace_start"() <{level = 10 : i32, message = "bqk,bkd->bqd"}> : () -> ()
    %cst_32 = arith.constant dense<0.000000e+00> : vector<2x8x32xf32>
    %105 = tpu.matmul %104, %90, %cst_32 {dimension_numbers = #tpu.dot_dimension_numbers<[2], [1], [1], [2], [0, 0, 0, 1, 1, 2], [0], [0]>} : vector<2x8x8xf32>, vector<2x8x32xf32>, vector<2x8x32xf32> -> vector<2x8x32xf32>
    "tpu.trace_stop"() : () -> ()
    %106 = vector.shape_cast %105 : vector<2x8x32xf32> to vector<16x32xf32>
    %c96 = arith.constant 96 : index
    %c0_33 = arith.constant 0 : index
    %107 = vector.load %arg3[%c96, %c0_33] : memref<128x128xf32, #tpu.memory_space<vmem>>, vector<32x128xf32>
    %cst_34 = arith.constant dense<0.000000e+00> : vector<16x128xf32>
    %108 = tpu.matmul %106, %107, %cst_34 {dimension_numbers = #tpu.dot_dimension_numbers<[1], [0], [0], [1], [0, 0, 1, 1], [], []>} : vector<16x32xf32>, vector<32x128xf32>, vector<16x128xf32> -> vector<16x128xf32>
    %109 = arith.addf %87, %108 : vector<16x128xf32>
    %110 = vector.shape_cast %109 : vector<16x128xf32> to vector<2x8x128xf32>
    %c0_35 = arith.constant 0 : index
    %c0_36 = arith.constant 0 : index
    %c0_37 = arith.constant 0 : index
    %111 = vector.load %arg5[%c0_35, %c0_36, %c0_37] : memref<2x8x128xf32, #tpu.memory_space<vmem>>, vector<2x8x128xf32>
    tpu.vector_store %arg5[%c0_35, %c0_36, %c0_37], %110 {strides = array<i32>} : memref<2x8x128xf32, #tpu.memory_space<vmem>>, vector<2x8x128xf32>,
    return
  }
  func.func @transform_0(%arg0: i32) -> (i32, i32, i32) {
    %c0_i32 = arith.constant 0 : i32
    %c0_i32_0 = arith.constant 0 : i32
    %c0_i32_1 = arith.constant 0 : i32
    return %arg0, %c0_i32, %c0_i32_0 : i32, i32, i32
  }
  func.func @transform_1(%arg0: i32) -> (i32, i32) {
    %c0_i32 = arith.constant 0 : i32
    %c0_i32_0 = arith.constant 0 : i32
    %c0_i32_1 = arith.constant 0 : i32
    return %c0_i32, %c0_i32_0 : i32, i32
  }
  func.func @transform_2(%arg0: i32) -> (i32, i32) {
    %c0_i32 = arith.constant 0 : i32
    %c0_i32_0 = arith.constant 0 : i32
    %c0_i32_1 = arith.constant 0 : i32
    return %c0_i32, %c0_i32_0 : i32, i32
  }
  func.func @transform_3(%arg0: i32) -> (i32, i32) {
    %c0_i32 = arith.constant 0 : i32
    %c0_i32_0 = arith.constant 0 : i32
    %c0_i32_1 = arith.constant 0 : i32
    return %c0_i32, %c0_i32_0 : i32, i32
  }
  func.func @transform_4(%arg0: i32) -> (i32, i32, i32) {
    %c0_i32 = arith.constant 0 : i32
    %c0_i32_0 = arith.constant 0 : i32
    %c0_i32_1 = arith.constant 0 : i32
    return %arg0, %c0_i32, %c0_i32_0 : i32, i32, i32
  }
}

</mosaic_0001>

<bundles_post_ra>
// kernel: tpu_custom_call.1
= control target key start
LH: loop header
LB: loop body
LE: loop exit
PB: predicated region body
PF: predicated region fallthrough
CT: control target
= control target key end

     0   :  { %9 = vsyncpa [#allocation3], 0  ;;  %s3206_s0 = inlined_call_operand.hbm [shape: f32[4,8,128], index: 0, kind: input, shape index: {}]   ;;  %s3207_s1 = inlined_call_operand.hbm [shape: f32[128,384], index: 1, kind: input, shape index: {}]   ;;  %s3208_s2 = inlined_call_operand.hbm [shape: f32[128,128], index: 2, kind: input, shape index: {}]   ;;  %s3209_s3 = inlined_call_operand.vmem [shape: f32[1,128], index: 3, kind: input, shape index: {}]   ;;  %s3210_s4 = inlined_call_operand.hbm [shape: f32[4,8,128], index: 4, kind: output, shape index: {}]  }
   0x1   :  { %11 = vsyncpa [#allocation3 + $0x1], 0 }
   0x2   :  { %12 = vsyncpa [#allocation6], 0 }
   0x3   :  { %13 = vsyncpa [#allocation4], 0 }
   0x4   :  { %15 = vsyncpa [#allocation4 + $0x1], 0  ;;  %s2822_s15 = smov 0   ;;  %s2824_s16 = smov 0  }
   0x5   :  { %s2826_s17 = smov 0   ;;  %s2828_s18 = smov 0  }
   0x6 LB: > { %s2843_s19 = sadd.s32 4294967295, %s2779_s18   ;;  %s2234_s20 = sadd.s32 4294967294, %s2779_s18   ;;  %s2779_s18 = sphi %s2828_s18, %s3232_s18   ;;  %s2775_s17 = sphi %s2826_s17, %s3231_s17   ;;  %s2771_s16 = sphi %s2824_s16, %s3230_s16   ;;  %s2767_s15 = sphi %s2822_s15, %s3229_s15  }
   0x7   : > { %p41_p0 = scmp.ne.s32.totalorder %s2771_s16, %s2767_s15  ;;  %p3211_p1 = scmp.eq.s32.totalorder %s2843_s19, 0 }
   0x8   : > { %p134_p3 = scmp.eq.s32.totalorder %s2234_s20, 1  ;;  %p2235_p5 = scmp.ge.s32.totalorder %s2779_s18, 1 }
   0x9   : > { %p2852_p4 = por %p3211_p1, %p41_p0  ;;  %p141_p7 = scmp.lt.s32.totalorder %s2779_s18, 3 }
   0xa   : > { %p2857_p6 = por %p134_p3, %p41_p0  ;;  %s2781_s24 = smov [#allocation5]  }
   0xb   : > { %s3215_s21 = scalar_select %p2852_p4, 1, 0 }
   0xc   : > { %s3216_s22 = scalar_select %p2857_p6, 1, 0 }
   0xd   : > { %p2862_p8 = pnand %p2235_p5, %p141_p7  ;;  %s153_s25 = sshll.u32 %s2781_s24, 4  ;;  %s154_s25 = int_to_ptr.vmem [resolvable:$true] %s153_s25 }
   0xe   : > { %s2782_s27 = smov [#allocation7]   ;;  %s2642_s29 = scalar_lea.vmem %s154_s25, 6144 }
   0xf   : > { %s3217_s23 = scalar_select %p2862_p8, 1, 0 }
  0x10   : > { %p2532_p9 = pneg %p2862_p8  ;;  %s166_s28 = sshll.u32 %s2782_s27, 4  ;;  %s167_s28 = int_to_ptr.vmem [resolvable:$true] %s166_s28 }
  0x11   : > { %p2643_p13 = scmp.ne.s32.totalorder %s154_s25, %s2642_s29  ;;  %p2650_p5 = scmp.lt.s32.totalorder %s154_s25, %s154_s25 }
  0x12   : > { %p2871_p11 = pnand %p2532_p9, %p3211_p1  ;;  %p2651_p7 = scmp.lt.s32.totalorder %s2642_s29, %s2642_s29 }
  0x14   : > { %p2633_p12 = pneg %p2871_p11  ;;  %p2652_p10 = por %p2651_p7, %p2650_p5 }
  0x16   : > { %p2645_p0 = pnand %p2643_p13, %p2633_p12 }
  0x18   : > { %p2646_p3 = pneg %p2645_p0 }
  0x1a   : > { %p2653_p9 = pnand %p2652_p10, %p2646_p3 }
  0x1c   : > { %2656 = shalt.err (!%p2653_p9)
}
  0x1d   : > { %s2783_s30 = smov 384   ;;  %s2784_s5 = smov 24  }
  0x1e   : > { %2535 = dma.hbm_to_vmem [thread:$0]  (!%p2871_p11), %s3207_s1, 6144, %s154_s25, [#allocation6], %s2783_s30, %s2783_s30, %s2784_s5  }
  0x1f   : > { %s2668_s8 = scalar_lea.vmem %s167_s28, 2048  ;;  %p2676_p2 = scmp.lt.s32.totalorder %s167_s28, %s167_s28 }
  0x20   : > { %p2669_p1 = scmp.ne.s32.totalorder %s167_s28, %s2668_s8  ;;  %p2677_p6 = scmp.lt.s32.totalorder %s2668_s8, %s2668_s8 }
  0x22   : > { %p2671_p13 = pnand %p2669_p1, %p2633_p12  ;;  %p2678_p5 = por %p2677_p6, %p2676_p2 }
  0x24   : > { %p2672_p0 = pneg %p2671_p13 }
  0x26   : > { %p2679_p10 = pnand %p2678_p5, %p2672_p0 }
  0x28   : > { %2682 = shalt.err (!%p2679_p10)
}
  0x29   : > { %s2785_s9 = smov 128   ;;  %s2786_s10 = smov 8  }
  0x2a   : > { %2538 = dma.hbm_to_vmem [thread:$0]  (!%p2871_p11), %s3208_s2, 2048, %s167_s28, [#allocation6], %s2785_s9, %s2785_s9, %s2786_s10  }
  0x2b   : > { %s2897_s13 = sadd.s32 1, %s2779_s18   ;;  %s28_s20 = sadd.s32 1, %s2775_s17 }
  0x2c   : > { %s25_s14 = ssub.s32 %s2779_s18, %s2897_s13  ;;  %p35_p2 = scmp.ne.s32.totalorder %s2775_s17, %s2771_s16 }
  0x2d   : > { %p26_p1 = scmp.eq.s32.totalorder %s25_s14, 0  ;;  %p36_p6 = scmp.eq.s32.totalorder %s2779_s18, 0 }
  0x2e   : > { %p3219_p3 = scmp.eq.s32.totalorder %s2843_s19, 1  ;;  %p2549_p9 = scmp.lt.s32.totalorder %s2779_s18, 2 }
  0x2f   : > { %s2906_s24 = scalar_select %p26_p1, %s2775_s17, %s28_s20  }
  0x30   : > { %p37_p12 = por %p36_p6, %p35_p2  ;;  %p2910_p7 = por %p3219_p3, %p35_p2 }
  0x31   : > { %s183_s26 = sand.u32 1, %s2775_s17   ;;  %s2285_s28 = sshll.u32 %s2779_s18, 8 }
  0x32   : > { %s3220_s25 = scalar_select %p2910_p7, 1, 0 }
  0x33   : > { %s2239_s27 = sshll.u32 %s183_s26, 4  ;;  %s2920_s5 = scalar_lea.hbm %s3206_s0, %s2285_s28 }
  0x34   : > { %s187_s6 = scalar_lea.vmem [#allocation2], %s2239_s27  ;;  %p2924_p11 = pnand %p2549_p9, %p37_p12 }
  0x35   : > { %s194_s7 = sshll.u32 %s187_s6, 4  ;;  %s2928_s11 = scalar_lea.sflag [#allocation3], %s183_s26  ;;  %s2922_s7 = int_to_ptr.vmem [resolvable:$true] %s194_s7 }
  0x36   : > { %s2683_s12 = scalar_lea.hbm %s2920_s5, 256  ;;  %p2685_p0 = pneg %p2924_p11 }
  0x37   : > { %p2684_p13 = scmp.ne.s32.totalorder %s2920_s5, %s2683_s12  ;;  %s2688_s27 = scalar_lea.hbm %s3206_s0, 512 }
  0x38   : > { %p2689_p1 = scmp.lt.s32.totalorder %s2920_s5, %s3206_s0  ;;  %p2690_p2 = scmp.lt.s32.totalorder %s2688_s27, %s2683_s12 }
  0x39   : > { %p2686_p5 = pnand %p2685_p0, %p2684_p13 }
  0x3a   : > { %p2691_p6 = por %p2690_p2, %p2689_p1 }
  0x3b   : > { %p2687_p10 = pneg %p2686_p5 }
  0x3d   : > { %p2692_p12 = pnand %p2691_p6, %p2687_p10 }
  0x3f   : > { %2695 = shalt.err (!%p2692_p12)
}
  0x40   : > { %s2696_s26 = scalar_lea.vmem %s2922_s7, 256  ;;  %s2787_s30 = smov [#allocation2]  }
  0x41   : > { %p2697_p3 = scmp.ne.s32.totalorder %s2922_s7, %s2696_s26  ;;  %s2701_s6 = sshll.u32 %s2787_s30, 4  ;;  %s2702_s6 = int_to_ptr.vmem [resolvable:$false] %s2701_s6 }
  0x42   : > { %s2703_s14 = scalar_lea.vmem %s2702_s6, 512  ;;  %p2704_p5 = scmp.lt.s32.totalorder %s2922_s7, %s2702_s6 }
  0x43   : > { %p2699_p9 = pnand %p2697_p3, %p2685_p0  ;;  %p2705_p7 = scmp.lt.s32.totalorder %s2703_s14, %s2696_s26 }
  0x45   : > { %p2700_p13 = pneg %p2699_p9  ;;  %p2706_p4 = por %p2705_p7, %p2704_p5 }
  0x47   : > { %p2707_p8 = pnand %p2706_p4, %p2700_p13 }
  0x49   : > { %2710 = shalt.err (!%p2707_p8)
}
  0x4a   : > { %2542 = dma.hbm_to_vmem [thread:$0]  (!%p2924_p11), %s2920_s5, 256, %s2922_s7, %s2928_s11, %s2785_s9, %s2785_s9, %s2786_s10  }
  0x4b   : > { %p3222_p0 = scmp.ne.s32.totalorder %s3217_s23, 0 }
  0x4c   : > { %s2955_s12 = sand.u32 (!%p3222_p0), 1, %s2771_s16   ;;  %p3223_p4 = scmp.ne.s32.totalorder (!%p3222_p0), %s3215_s21, 0 }
  0x4d   : > { %206 = sbr.rel (%p3222_p0) target bundleno = 2777 (0xad9), region = 36  ;;  %s2243_s20 = sshll.u32 (!%p3222_p0), %s2955_s12, 4 }
  0x4e   : > { %s209_s27 = scalar_lea.sflag (!%p3222_p0), [#allocation3], %s2955_s12  ;;  %s2961_s8 = scalar_lea.vmem (!%p3222_p0), [#allocation2], %s2243_s20 }
  0x52   : > { %2754 = dma.done.wait (%p3223_p4), %s209_s27, 256  }
  0x53   : > { %2756 = vsyncadd (%p3223_p4), %s209_s27, 4294967040  ;;  %p3224_p8 = scmp.eq.s32.totalorder %s2843_s19, 0 }
  0x55   : > { %2758 = dma.done.wait (%p3224_p8), [#allocation6], 8192   ;;  %p3225_p7 = pmov %p3224_p8 }
  0x56   : > { %v2788_v0 = vmov 0.0   ;;  %v295_v1 = vld [vmem:[#allocation5 + $0x170] sm:$0xff]  ;;  %v294_v2 = vld [vmem:[#allocation5 + $0x168] sm:$0xff]  ;;  %v292_v3 = vld [vmem:[#allocation5 + $0x158] sm:$0xff]  ;;  %vm2789_vm0 = vmmov 0   ;;  %vm464_vm1 = vcmask 261120   ;;  %v451_v59 = vlaneseq }
  0x57   : > { %2760 = vsyncadd (%p3225_p7), [#allocation6], 4294959104  ;;  %361 = vmatprep.mubr.f32.mxu0 %v2788_v0  ;;  %297 = vmatprep.subr.mxu0 %v295_v1  ;;  %v291_v4 = vld [vmem:[#allocation5 + $0x150] sm:$0xff]  ;;  %v289_v5 = vld [vmem:[#allocation5 + $0x140] sm:$0xff]  ;;  %s2790_s21 = smov 96   ;;  %vm617_vm3 = vcmask 64512  }
  0x58   : > { %298 = vmatpush1.msra.mxu0 %v294_v2  ;;  %v288_v6 = vld [vmem:[#allocation5 + $0x138] sm:$0xff]  ;;  %v286_v7 = vld [vmem:[#allocation5 + $0x128] sm:$0xff]  ;;  %v285_v8 = vld [vmem:[#allocation5 + $0x120] sm:$0xff]  ;;  %v452_v60 = vshrl.u32 %v451_v59, 7  ;;  %v454_v61 = vand.u32 127, %v451_v59  ;;  %s2792_s23 = smov 64  }
  0x59   : > { %299 = vmatprep.subr.mxu0 %v292_v3  ;;  %v283_v9 = vld [vmem:[#allocation5 + $0x110] sm:$0xff]  ;;  %v282_v10 = vld [vmem:[#allocation5 + $0x108] sm:$0xff]  ;;  %v280_v11 = vld [vmem:[#allocation5 + $0xf8] sm:$0xff]  ;;  %v2791_v1 = vmov -1e+30   ;;  %s2793_s9 = smov 32  }
  0x5a   : > { %300 = vmatpush1.msra.mxu0 %v291_v4  ;;  %v279_v12 = vld [vmem:[#allocation5 + $0xf0] sm:$0xff]  ;;  %v277_v13 = vld [vmem:[#allocation5 + $0xe0] sm:$0xff]  ;;  %v276_v15 = vld [vmem:[#allocation5 + $0xd8] sm:$0xff]  ;;  %vm455_vm2 = vcmp.le.s32.totalorder %v454_v61, %v452_v60  ;;  %s244_s7 = scalar_lea.vmem [#allocation8], %s2243_s20  ;;  %s2286_s28 = sshll.u32 %s2843_s19, 8 }
  0x5b   : > { %301 = vmatprep.subr.mxu0 %v289_v5  ;;  %v2973_v14 = vld [vmem:[%s2961_s8] sm:$0xff]  ;;  %v296_v16 = vld [vmem:[#allocation5 + $0x178] sm:$0xff]  ;;  %v274_v18 = vld [vmem:[#allocation5 + $0xc8] sm:$0xff]  ;;  %v3020_v2 = vsel %vm455_vm2, 0.0, %v2791_v1  ;;  %s2142_s11 = sshll.u32 %s244_s7, 4  ;;  %s3163_s30 = scalar_lea.hbm %s3210_s4, %s2286_s28  ;;  %s3158_s11 = int_to_ptr.vmem [resolvable:$true] %s2142_s11 }
  0x5c   : > { %302 = vmatpush1.msra.mxu0 %v288_v6  ;;  %v293_v17 = vld [vmem:[#allocation5 + $0x160] sm:$0xff]  ;;  %2393 = vmatprep.mubr.f32.mxu1 %v2973_v14  ;;  %v290_v20 = vld [vmem:[#allocation5 + $0x148] sm:$0xff]  ;;  %v271_v21 = vld [vmem:[#allocation5 + $0xb0] sm:$0xff]  ;;  %s2129_s6 = scalar_lea.sflag [#allocation4], %s2955_s12  ;;  %s2711_s14 = scalar_lea.vmem %s3158_s11, 256 }
  0x5d   : > { %303 = vmatprep.subr.mxu0 %v286_v7  ;;  %2361 = vmatprep.subr.mxu1 %v296_v16  ;;  %v273_v19 = vld [vmem:[#allocation5 + $0xc0] sm:$0xff]  ;;  %v270_v22 = vld [vmem:[#allocation5 + $0xa8] sm:$0xff]  ;;  %v287_v23 = vld [vmem:[#allocation5 + $0x130] sm:$0xff]  ;;  %p2712_p11 = scmp.ne.s32.totalorder %s3158_s11, %s2711_s14  ;;  %p3226_p10 = scmp.ne.s32.totalorder %s3220_s25, 0 }
  0x5e   : > { %304 = vmatpush1.msra.mxu0 %v285_v8  ;;  %2362 = vmatpush3.msra.mxu1 %v296_v16  ;;  %v268_v24 = vld [vmem:[#allocation5 + $0x98] sm:$0xff]  ;;  %v267_v25 = vld [vmem:[#allocation5 + $0x90] sm:$0xff]  ;;  %v265_v27 = vld [vmem:[#allocation5 + $0x80] sm:$0xff]  ;;  %s2794_s19 = smov [#allocation8]  }
  0x5f   : > { %305 = vmatprep.subr.mxu0 %v283_v9  ;;  %2363 = vmatprep.subr.mxu1 %v293_v17  ;;  %v284_v26 = vld [vmem:[#allocation5 + $0x118] sm:$0xff]  ;;  %v281_v29 = vld [vmem:[#allocation5 + $0x100] sm:$0xff]  ;;  %v262_v30 = vld [vmem:[#allocation5 + $0x68] sm:$0xff]  ;;  %p2713_p1 = pnand %p2712_p11, %p3226_p10  ;;  %s2715_s20 = sshll.u32 %s2794_s19, 4  ;;  %s2716_s20 = int_to_ptr.vmem [resolvable:$false] %s2715_s20 }
  0x60   : > { %306 = vmatpush1.msra.mxu0 %v282_v10  ;;  %2364 = vmatpush3.msra.mxu1 %v293_v17  ;;  %v264_v28 = vld [vmem:[#allocation5 + $0x78] sm:$0xff]  ;;  %v261_v31 = vld [vmem:[#allocation5 + $0x60] sm:$0xff]  ;;  %v278_v32 = vld [vmem:[#allocation5 + $0xe8] sm:$0xff]  ;;  %s2717_s27 = scalar_lea.vmem %s2716_s20, 512  ;;  %p2718_p6 = scmp.lt.s32.totalorder %s3158_s11, %s2716_s20 }
  0x61   : > { %307 = vmatprep.subr.mxu0 %v280_v11  ;;  %2365 = vmatprep.subr.mxu1 %v290_v20  ;;  %v259_v33 = vld [vmem:[#allocation5 + $0x50] sm:$0xff]  ;;  %v258_v34 = vld [vmem:[#allocation5 + $0x48] sm:$0xff]  ;;  %v256_v36 = vld [vmem:[#allocation5 + $0x38] sm:$0xff]  ;;  %p2714_p2 = pneg %p2713_p1  ;;  %p2719_p12 = scmp.lt.s32.totalorder %s2717_s27, %s2711_s14 }
  0x62   : > { %308 = vmatpush1.msra.mxu0 %v279_v12  ;;  %2366 = vmatpush3.msra.mxu1 %v290_v20  ;;  %v275_v35 = vld [vmem:[#allocation5 + $0xd0] sm:$0xff]  ;;  %v272_v38 = vld [vmem:[#allocation5 + $0xb8] sm:$0xff]  ;;  %v253_v39 = vld [vmem:[#allocation5 + $0x20] sm:$0xff] }
  0x63   : > { %309 = vmatprep.subr.mxu0 %v277_v13  ;;  %2367 = vmatprep.subr.mxu1 %v287_v23  ;;  %v255_v37 = vld [vmem:[#allocation5 + $0x30] sm:$0xff]  ;;  %v252_v40 = vld [vmem:[#allocation5 + $0x18] sm:$0xff]  ;;  %v269_v41 = vld [vmem:[#allocation5 + $0xa0] sm:$0xff]  ;;  %p2720_p3 = por %p2719_p12, %p2718_p6 }
  0x64   : > { %310 = vmatpush1.msra.mxu0 %v276_v15  ;;  %2368 = vmatpush3.msra.mxu1 %v287_v23  ;;  %v250_v42 = vld [vmem:[#allocation5 + $0x8] sm:$0xff]  ;;  %v249_v43 = vld [vmem:[#allocation5] sm:$0xff]  ;;  %v263_v45 = vld [vmem:[#allocation5 + $0x70] sm:$0xff] }
  0x65   : > { %311 = vmatprep.subr.mxu0 %v274_v18  ;;  %2369 = vmatprep.subr.mxu1 %v284_v26  ;;  %v266_v44 = vld [vmem:[#allocation5 + $0x88] sm:$0xff]  ;;  %v260_v46 = vld [vmem:[#allocation5 + $0x58] sm:$0xff]  ;;  %v257_v48 = vld [vmem:[#allocation5 + $0x40] sm:$0xff]  ;;  %p2721_p9 = pnand %p2720_p3, %p2714_p2 }
  0x66   : > { %312 = vmatpush1.msra.mxu0 %v273_v19  ;;  %2370 = vmatpush3.msra.mxu1 %v284_v26  ;;  %v248_v47 = vld [vmem:[%s2961_s8 + $0x8] sm:$0xff]  ;;  %v251_v50 = vld [vmem:[#allocation5 + $0x10] sm:$0xff] }
  0x67   : > { %313 = vmatprep.subr.mxu0 %v271_v21  ;;  %2371 = vmatprep.subr.mxu1 %v281_v29  ;;  %v254_v49 = vld [vmem:[#allocation5 + $0x28] sm:$0xff]  ;;  %v789_v60 = vld [vmem:[#allocation7 + $0x18] sm:$0xff]  ;;  %v788_v61 = vld [vmem:[#allocation7 + $0x10] sm:$0xff] }
  0x68   : > { %314 = vmatpush1.msra.mxu0 %v270_v22  ;;  %2372 = vmatpush3.msra.mxu1 %v281_v29 }
  0x69   : > { %315 = vmatprep.subr.mxu0 %v268_v24  ;;  %2373 = vmatprep.subr.mxu1 %v278_v32 }
  0x6a   : > { %316 = vmatpush1.msra.mxu0 %v267_v25  ;;  %2374 = vmatpush3.msra.mxu1 %v278_v32 }
  0x6b   : > { %317 = vmatprep.subr.mxu0 %v265_v27  ;;  %2375 = vmatprep.subr.mxu1 %v275_v35 }
  0x6c   : > { %318 = vmatpush1.msra.mxu0 %v264_v28  ;;  %2376 = vmatpush3.msra.mxu1 %v275_v35 }
  0x6d   : > { %319 = vmatprep.subr.mxu0 %v262_v30  ;;  %2377 = vmatprep.subr.mxu1 %v272_v38 }
  0x6e   : > { %320 = vmatpush1.msra.mxu0 %v261_v31  ;;  %2378 = vmatpush3.msra.mxu1 %v272_v38 }
  0x6f   : > { %321 = vmatprep.subr.mxu0 %v259_v33  ;;  %2379 = vmatprep.subr.mxu1 %v269_v41 }
  0x70   : > { %322 = vmatpush1.msra.mxu0 %v258_v34  ;;  %2380 = vmatpush3.msra.mxu1 %v269_v41 }
  0x71   : > { %323 = vmatprep.subr.mxu0 %v256_v36  ;;  %2381 = vmatprep.subr.mxu1 %v266_v44 }
  0x72   : > { %324 = vmatpush1.msra.mxu0 %v255_v37  ;;  %2382 = vmatpush3.msra.mxu1 %v266_v44 }
  0x73   : > { %325 = vmatprep.subr.mxu0 %v253_v39  ;;  %2383 = vmatprep.subr.mxu1 %v263_v45 }
  0x74   : > { %326 = vmatpush1.msra.mxu0 %v252_v40  ;;  %2384 = vmatpush3.msra.mxu1 %v263_v45 }
  0x75   : > { %327 = vmatprep.subr.mxu0 %v250_v42  ;;  %2385 = vmatprep.subr.mxu1 %v260_v46 }
  0x76   : > { %328 = vmatpush1.msra.mxu0 %v249_v43  ;;  %2386 = vmatpush3.msra.mxu1 %v260_v46 }
  0x77   : > { %362 = vmatmul.mubr.f32.vlgmr.msra.gmra.mxu0 %v2973_v14  ;;  %2401 = vmatprep.subr.mxu0 %v2788_v0 }
  0x78   : > { %367 = vmatprep.mubr.f32.mxu0 %v2788_v0  ;;  %2387 = vmatprep.subr.mxu1 %v257_v48 }
  0x79   : > { %2388 = vmatpush3.msra.mxu1 %v257_v48 }
  0x7a   : > { %2389 = vmatprep.subr.mxu1 %v254_v49 }
  0x7b   : > { %368 = vmatmul.mubr.f32.gmra.mxu0 %v248_v47  ;;  %2390 = vmatpush3.msra.mxu1 %v254_v49 }
  0x7c   : > { %2391 = vmatprep.subr.mxu1 %v251_v50  ;;  %2403 = vmatprep.mubr.msk.f32.mxu0 %vm2789_vm0, %v2788_v0 }
  0x7d   : > { %2392 = vmatpush3.msra.mxu1 %v251_v50 }
  0x7e   : > { %2394 = vmatmul.mubr.f32.vlgmr.msra.gmra.mxu1 %v248_v47  ;;  %2396 = vmatprep.subr.mxu1 %v2788_v0 }
  0x7f   : > { %2398 = vmatprep.mubr.msk.f32.mxu1 %vm2789_vm0, %v2788_v0 }
 0x137   : > { %v363_v51 = vpop.f32.mrf.mxu0 }
 0x138   : > { %v2991_v53 = vmul.f32 0.17677669, %v363_v51 }
 0x139   : > { %v2985_v52 = vpop.f32.mrf.mxu0 }
 0x13a   : > { %875 = vrot.lane.b32.xlu1 %v2985_v52, %s2790_s21  ;;  %2397 = vmatpush3.xpose.msk.msra.mxu1 %vm464_vm1, %v2985_v52 }
 0x13b   : > { %v369_v54 = vpop.f32.mrf.mxu0  ;;  %2406 = vmatprep.subr.mxu1 %v2788_v0 }
 0x13c   : > { %v3002_v56 = vmul.f32 0.17677669, %v369_v54 }
 0x13d   : > { %v2994_v55 = vpop.f32.mrf.mxu0  ;;  %2399 = vmatmul.mubr.msk.f32.vlgmr.msra.gmra.mxu1 %vm464_vm1, %v2991_v53 }
 0x13e   : > { %873 = vrot.lane.b32.xlu1 %v2991_v53, %s2790_s21  ;;  %2402 = vmatpush3.xpose.msk.msra.mxu0 %vm464_vm1, %v2994_v55  ;;  %v3013_v57 = vpop.f32.mrf.mxu1 }
 0x13f   : > { %2411 = vmatprep.subr.mxu0 %v2788_v0  ;;  %2408 = vmatprep.mubr.msk.f32.mxu1 %vm2789_vm0, %v2788_v0 }
 0x140   : > { %v3016_v58 = vpop.f32.mrf.mxu1 }
 0x141   : > { %2404 = vmatmul.mubr.msk.f32.vlgmr.msra.gmra.mxu0 %vm464_vm1, %v3002_v56  ;;  %2407 = vmatpush3.msra.mxu1 %v3016_v58 }
 0x142   : > { %951 = vrot.lane.b32.xlu1 %v3002_v56, %s2790_s21  ;;  %2413 = vmatprep.mubr.msk.f32.mxu0 %vm2789_vm0, %v2788_v0 }
 0x143   : > { %2412 = vmatpush3.msra.mxu0 %v3013_v57  ;;  %2416 = vmatprep.subr.mxu1 %v789_v60 }
 0x144   : > { %2427 = vmatprep.subr.mxu0 %v2788_v0 }
 0x1ac   : > { %v876_v13 = vpop.permute.xlu1 %875 }
 0x1b0   : > { %v874_v16 = vpop.permute.xlu1 %873 }
 0x1b4   : > { %v952_v18 = vpop.permute.xlu1 %951 }
 0x1fd   : > { %v537_v62 = vpop.f32.mrf.mxu1 }
 0x1fe   : > { %v538_v27 = vadd.f32 %v537_v62, %v3020_v2  ;;  %v787_v62 = vld [vmem:[#allocation7 + $0x8] sm:$0xff] }
 0x1ff   : > { %v2400_v63 = vpop.f32.mrf.mxu1 }
 0x200   : > { %v618_v29 = vsel %vm617_vm3, %v538_v27, -inf  ;;  %v786_v63 = vld [vmem:[#allocation7] sm:$0xff] }
 0x201   : > { %v613_v3 = vpop.f32.mrf.mxu0 }
 0x202   : > { %v614_v4 = vadd.f32 %v613_v3, %v3020_v2 }
 0x203   : > { %v2405_v5 = vpop.f32.mrf.mxu0 }
 0x204   : > { %v621_v6 = vsel %vm617_vm3, %v614_v4, -inf }
 0x205   : > { %622 = vmax.xlane.f32.xlu0 %v621_v6 }
 0x28e   : > { %v623_v7 = vpop.xlane.xlu0 %622 }
 0x28f   : > { %v625_v8 = vsub.f32 %v614_v4, %v623_v7 }
 0x291   : > { %v628_v9 = vmul.f32 1.442695, %v625_v8 }
 0x293   : > { %2599 = vpow2.f32 %v628_v9 }
 0x2a0   : > { %v2600_v10 = vpop.eup %2599 }
 0x2a1   : > { %v633_v11 = vsel %vm617_vm3, %v2600_v10, 0.0 }
 0x2a2   : > { %634 = vadd.xlane.f32.xlu0 %v633_v11 }
 0x2b8   : > { %953 = vrot.lane.b32.xlu0 %v2994_v55, %s2790_s21 }
 0x32b   : > { %v635_v12 = vpop.xlane.xlu0 %634 }
 0x32c   : > { %2601 = vrcp.f32 %v635_v12 }
 0x32f   : > { %v954_v17 = vpop.permute.xlu0 %953 }
 0x339   : > { %v2602_v14 = vpop.eup %2601 }
 0x33a   : > { %v639_v15 = vmul.f32 %v2602_v14, %v2600_v10 }
 0x33c   : > { %2414 = vmatmul.mubr.msk.f32.vlgmr.msra.gmra.mxu0 %vm617_vm3, %v639_v15 }
 0x33d   : > { %2428 = vmatpush3.xpose.msk.msra.mxu0 %vm464_vm1, %v876_v13  ;;  %2429 = vmatprep.mubr.msk.f32.mxu0 %vm2789_vm0, %v2788_v0 }
 0x33e   : > { %2432 = vmatprep.subr.mxu0 %v2788_v0 }
 0x340   : > { %2430 = vmatmul.mubr.msk.f32.vlgmr.msra.gmra.mxu0 %vm464_vm1, %v874_v16  ;;  %v1208_v16 = vld [vmem:[#allocation7 + $0x38] sm:$0xff] }
 0x341   : > { %2433 = vmatpush3.xpose.msk.msra.mxu0 %vm464_vm1, %v954_v17  ;;  %2434 = vmatprep.mubr.msk.f32.mxu0 %vm2789_vm0, %v2788_v0  ;;  %v1207_v17 = vld [vmem:[#allocation7 + $0x30] sm:$0xff] }
 0x342   : > { %2442 = vmatprep.subr.mxu0 %v2788_v0 }
 0x344   : > { %2435 = vmatmul.mubr.msk.f32.vlgmr.msra.gmra.mxu0 %vm464_vm1, %v952_v18  ;;  %v1206_v18 = vld [vmem:[#allocation7 + $0x28] sm:$0xff] }
 0x345   : > { %2444 = vmatprep.mubr.msk.f32.mxu0 %vm2789_vm0, %v2788_v0 }
 0x3fc   : > { %v3040_v19 = vpop.f32.mrf.mxu0 }
 0x3fe   : > { %v2415_v20 = vpop.f32.mrf.mxu0 }
 0x3ff   : > { %v1205_v20 = vld [vmem:[#allocation7 + $0x20] sm:$0xff] }
 0x400   : > { %v947_v21 = vpop.f32.mrf.mxu0 }
 0x401   : > { %v948_v28 = vadd.f32 %v947_v21, %v3020_v2 }
 0x402   : > { %v2431_v22 = vpop.f32.mrf.mxu0 }
 0x403   : > { %v1029_v30 = vsel %vm617_vm3, %v948_v28, -inf }
 0x404   : > { %v1025_v23 = vpop.f32.mrf.mxu0 }
 0x405   : > { %v1026_v24 = vadd.f32 %v1025_v23, %v3020_v2 }
 0x406   : > { %v2436_v25 = vpop.f32.mrf.mxu0 }
 0x407   : > { %v1032_v26 = vsel %vm617_vm3, %v1026_v24, -inf }
 0x408   : > { %1033 = vmax.xlane.f32.xlu1 %v1032_v26 }
 0x419   : > { %1129 = vrot.lane.b32.xlu1 %v3013_v57, %s2790_s21 }
 0x41d   : > { %1292 = vrot.lane.b32.xlu1 %v2991_v53, %s2792_s23 }
 0x421   : > { %1372 = vrot.lane.b32.xlu1 %v2994_v55, %s2792_s23 }
 0x425   : > { %1370 = vrot.lane.b32.xlu1 %v3002_v56, %s2792_s23 }
 0x449   : > { %619 = vmax.xlane.f32.xlu1 %v618_v29 }
 0x44d   : > { %1030 = vmax.xlane.f32.xlu1 %v1029_v30 }
 0x491   : > { %v1034_v31 = vpop.xlane.xlu1 %1033 }
 0x492   : > { %v1036_v32 = vsub.f32 %v1026_v24, %v1034_v31 }
 0x494   : > { %v1039_v33 = vmul.f32 1.442695, %v1036_v32 }
 0x495   : > { %v1130_v34 = vpop.permute.xlu1 %1129 }
 0x496   : > { %2603 = vpow2.f32 %v1039_v33  ;;  %2443 = vmatpush3.msra.mxu0 %v1130_v34 }
 0x497   : > { %2458 = vmatprep.subr.mxu0 %v2788_v0 }
 0x499   : > { %v1293_v37 = vpop.permute.xlu1 %1292 }
 0x49d   : > { %v1373_v38 = vpop.permute.xlu1 %1372 }
 0x4a1   : > { %v1371_v39 = vpop.permute.xlu1 %1370 }
 0x4a3   : > { %v2604_v35 = vpop.eup %2603 }
 0x4a4   : > { %v1044_v36 = vsel %vm617_vm3, %v2604_v35, 0.0 }
 0x4a5   : > { %1045 = vadd.xlane.f32.xlu0 %v1044_v36 }
 0x4bb   : > { %1294 = vrot.lane.b32.xlu0 %v2985_v52, %s2792_s23 }
 0x4d2   : > { %v620_v40 = vpop.xlane.xlu1 %619 }
 0x4d3   : > { %v624_v41 = vsub.f32 %v538_v27, %v620_v40 }
 0x4d5   : > { %v626_v42 = vmul.f32 1.442695, %v624_v41 }
 0x4d6   : > { %v1031_v43 = vpop.xlane.xlu1 %1030 }
 0x4d7   : > { %2605 = vpow2.f32 %v626_v42  ;;  %v1035_v44 = vsub.f32 %v948_v28, %v1031_v43  ;;  %v3129_v43 = vld [vmem:[%s3209_s3] ss:$0 sm:$0xff] }
 0x4d9   : > { %v1037_v45 = vmul.f32 1.442695, %v1035_v44 }
 0x4db   : > { %2607 = vpow2.f32 %v1037_v45 }
 0x4e4   : > { %v2606_v46 = vpop.eup %2605 }
 0x4e5   : > { %v630_v47 = vsel %vm617_vm3, %v2606_v46, 0.0 }
 0x4e6   : > { %631 = vadd.xlane.f32.xlu0 %v630_v47 }
 0x4e8   : > { %v2608_v48 = vpop.eup %2607 }
 0x4e9   : > { %v1041_v49 = vsel %vm617_vm3, %v2608_v48, 0.0 }
 0x4ea   : > { %1042 = vadd.xlane.f32.xlu1 %v1041_v49 }
 0x4fb   : > { %1052 = vrot.lane.b32.xlu1 %v3016_v58, %s2790_s21 }
 0x4ff   : > { %1711 = vrot.lane.b32.xlu1 %v2985_v52, %s2793_s9 }
 0x503   : > { %1709 = vrot.lane.b32.xlu1 %v2991_v53, %s2793_s9 }
 0x507   : > { %1787 = vrot.lane.b32.xlu1 %v3002_v56, %s2793_s9 }
 0x52e   : > { %v1046_v50 = vpop.xlane.xlu0 %1045 }
 0x52f   : > { %2609 = vrcp.f32 %v1046_v50 }
 0x532   : > { %v1295_v59 = vpop.permute.xlu0 %1294 }
 0x53c   : > { %v2610_v51 = vpop.eup %2609 }
 0x53d   : > { %v1050_v54 = vmul.f32 %v2610_v51, %v2604_v35 }
 0x53f   : > { %2445 = vmatmul.mubr.msk.f32.vlgmr.msra.gmra.mxu0 %vm617_vm3, %v1050_v54 }
 0x540   : > { %2459 = vmatpush3.xpose.msk.msra.mxu0 %vm464_vm1, %v1295_v59  ;;  %2460 = vmatprep.mubr.msk.f32.mxu0 %vm2789_vm0, %v2788_v0 }
 0x541   : > { %2463 = vmatprep.subr.mxu0 %v2788_v0 }
 0x543   : > { %2461 = vmatmul.mubr.msk.f32.vlgmr.msra.gmra.mxu0 %vm464_vm1, %v1293_v37 }
 0x544   : > { %2464 = vmatpush3.xpose.msk.msra.mxu0 %vm464_vm1, %v1373_v38  ;;  %2465 = vmatprep.mubr.msk.f32.mxu0 %vm2789_vm0, %v2788_v0 }
 0x545   : > { %2473 = vmatprep.subr.mxu0 %v2788_v0 }
 0x547   : > { %2466 = vmatmul.mubr.msk.f32.vlgmr.msra.gmra.mxu0 %vm464_vm1, %v1371_v39 }
 0x548   : > { %2475 = vmatprep.mubr.msk.f32.mxu0 %vm2789_vm0, %v2788_v0 }
 0x56f   : > { %v632_v52 = vpop.xlane.xlu0 %631 }
 0x570   : > { %2611 = vrcp.f32 %v632_v52 }
 0x573   : > { %v1043_v10 = vpop.xlane.xlu1 %1042 }
 0x574   : > { %2613 = vrcp.f32 %v1043_v10 }
 0x577   : > { %v1053_v13 = vpop.permute.xlu1 %1052 }
 0x57b   : > { %v1712_v32 = vpop.permute.xlu1 %1711 }
 0x57d   : > { %v2612_v53 = vpop.eup %2611 }
 0x57e   : > { %v638_v56 = vmul.f32 %v2612_v53, %v2606_v46 }
 0x57f   : > { %v1710_v34 = vpop.permute.xlu1 %1709 }
 0x580   : > { %2409 = vmatmul.mubr.msk.f32.vlgmr.msra.gmra.mxu1 %vm617_vm3, %v638_v56 }
 0x581   : > { %2417 = vmatpush3.msra.mxu1 %v789_v60  ;;  %v2614_v12 = vpop.eup %2613 }
 0x582   : > { %2418 = vmatprep.subr.mxu1 %v788_v61  ;;  %v1049_v15 = vmul.f32 %v2614_v12, %v2608_v48 }
 0x583   : > { %2419 = vmatpush3.msra.mxu1 %v788_v61  ;;  %v1788_v36 = vpop.permute.xlu1 %1787 }
 0x584   : > { %2420 = vmatprep.subr.mxu1 %v787_v62 }
 0x585   : > { %2421 = vmatpush3.msra.mxu1 %v787_v62 }
 0x586   : > { %2422 = vmatprep.subr.mxu1 %v786_v63 }
 0x587   : > { %2423 = vmatpush3.msra.mxu1 %v786_v63  ;;  %v1625_v63 = vld [vmem:[#allocation7 + $0x58] sm:$0xff] }
 0x588   : > { %2437 = vmatprep.subr.mxu1 %v2788_v0 }
 0x5ff   : > { %v1201_v1 = vpop.f32.mrf.mxu0 }
 0x601   : > { %v2446_v3 = vpop.f32.mrf.mxu0 }
 0x602   : > { %v1623_v3 = vld [vmem:[#allocation7 + $0x48] sm:$0xff] }
 0x603   : > { %v1366_v4 = vpop.f32.mrf.mxu0 }
 0x604   : > { %v1367_v25 = vadd.f32 %v1366_v4, %v3020_v2  ;;  %v1622_v4 = vld [vmem:[#allocation7 + $0x40] sm:$0xff] }
 0x605   : > { %v2462_v5 = vpop.f32.mrf.mxu0 }
 0x606   : > { %v1448_v26 = vsel %vm617_vm3, %v1367_v25, -inf }
 0x607   : > { %v1444_v6 = vpop.f32.mrf.mxu0 }
 0x608   : > { %v1445_v7 = vadd.f32 %v1444_v6, %v3020_v2 }
 0x609   : > { %v2467_v8 = vpop.f32.mrf.mxu0 }
 0x60a   : > { %v1451_v9 = vsel %vm617_vm3, %v1445_v7, -inf }
 0x60b   : > { %1452 = vmax.xlane.f32.xlu0 %v1451_v9 }
 0x640   : > { %v709_v11 = vpop.f32.mrf.mxu1 }
 0x641   : > { %2424 = vmatprep.mubr.msk.f32.mxu1 %vm464_vm1, %v709_v11 }
 0x642   : > { %v2410_v14 = vpop.f32.mrf.mxu1  ;;  %2425 = vmatmul.mubr.msk.f32.vlgmr.msra.gmra.mxu1 %vm464_vm1, %v3040_v19 }
 0x643   : > { %2438 = vmatpush3.msra.mxu1 %v1053_v13  ;;  %2439 = vmatprep.mubr.msk.f32.mxu1 %vm2789_vm0, %v2788_v0 }
 0x644   : > { %2447 = vmatprep.subr.mxu1 %v1208_v16 }
 0x646   : > { %2440 = vmatmul.mubr.msk.f32.vlgmr.msra.gmra.mxu1 %vm617_vm3, %v1049_v15 }
 0x647   : > { %2448 = vmatpush3.msra.mxu1 %v1208_v16 }
 0x648   : > { %2449 = vmatprep.subr.mxu1 %v1207_v17 }
 0x649   : > { %2450 = vmatpush3.msra.mxu1 %v1207_v17 }
 0x64a   : > { %2451 = vmatprep.subr.mxu1 %v1206_v18 }
 0x64b   : > { %2452 = vmatpush3.msra.mxu1 %v1206_v18  ;;  %v2042_v18 = vld [vmem:[#allocation7 + $0x78] sm:$0xff] }
 0x64c   : > { %2453 = vmatprep.subr.mxu1 %v1205_v20 }
 0x64d   : > { %2454 = vmatpush3.msra.mxu1 %v1205_v20 }
 0x64e   : > { %2468 = vmatprep.subr.mxu1 %v2788_v0 }
 0x694   : > { %v1453_v19 = vpop.xlane.xlu0 %1452 }
 0x695   : > { %v1455_v21 = vsub.f32 %v1445_v7, %v1453_v19 }
 0x697   : > { %v1458_v22 = vmul.f32 1.442695, %v1455_v21 }
 0x699   : > { %2615 = vpow2.f32 %v1458_v22 }
 0x6a6   : > { %v2616_v23 = vpop.eup %2615 }
 0x6a7   : > { %v1463_v24 = vsel %vm617_vm3, %v2616_v23, 0.0 }
 0x6a8   : > { %1464 = vadd.xlane.f32.xlu0 %v1463_v24 }
 0x6be   : > { %1546 = vrot.lane.b32.xlu0 %v3013_v57, %s2792_s23 }
 0x6c2   : > { %1789 = vrot.lane.b32.xlu0 %v2994_v55, %s2793_s9 }
 0x6e1   : > { %1449 = vmax.xlane.f32.xlu0 %v1448_v26  ;;  %v2039_v26 = vld [vmem:[#allocation7 + $0x60] sm:$0xff] }
 0x6f7   : > { %1470 = vrot.lane.b32.xlu0 %v3016_v58, %s2792_s23 }
 0x6fb   : > { %1887 = vrot.lane.b32.xlu0 %v3016_v58, %s2793_s9 }
 0x702   : > { %v2426_v27 = vpop.f32.mrf.mxu1 }
 0x703   : > { %v872_v44 = vadd.f32 %v2426_v27, %v3129_v43 }
 0x704   : > { %v3105_v28 = vpop.f32.mrf.mxu1 }
 0x706   : > { %v1124_v29 = vpop.f32.mrf.mxu1 }
 0x707   : > { %2455 = vmatprep.mubr.msk.f32.mxu1 %vm464_vm1, %v1124_v29 }
 0x708   : > { %v2441_v30 = vpop.f32.mrf.mxu1  ;;  %2456 = vmatmul.mubr.msk.f32.vlgmr.msra.gmra.mxu1 %vm464_vm1, %v1201_v1  ;;  %v1624_v1 = vld [vmem:[#allocation7 + $0x50] sm:$0xff] }
 0x709   : > { %2470 = vmatprep.mubr.msk.f32.mxu1 %vm2789_vm0, %v2788_v0 }
 0x731   : > { %v1465_v55 = vpop.xlane.xlu0 %1464 }
 0x732   : > { %2617 = vrcp.f32 %v1465_v55 }
 0x735   : > { %v1547_v31 = vpop.permute.xlu0 %1546 }
 0x736   : > { %2474 = vmatpush3.msra.mxu0 %v1547_v31 }
 0x737   : > { %2489 = vmatprep.subr.mxu0 %v2788_v0 }
 0x739   : > { %v1790_v35 = vpop.permute.xlu0 %1789 }
 0x73f   : > { %v2618_v58 = vpop.eup %2617 }
 0x740   : > { %v1469_v33 = vmul.f32 %v2618_v58, %v2616_v23  ;;  %v2041_v23 = vld [vmem:[#allocation7 + $0x70] sm:$0xff] }
 0x742   : > { %2476 = vmatmul.mubr.msk.f32.vlgmr.msra.gmra.mxu0 %vm617_vm3, %v1469_v33  ;;  %v871_v33 = vadd.f32 %v3129_v43, %v3105_v28 }
 0x743   : > { %2490 = vmatpush3.xpose.msk.msra.mxu0 %vm464_vm1, %v1712_v32  ;;  %2491 = vmatprep.mubr.msk.f32.mxu0 %vm2789_vm0, %v2788_v0 }
 0x744   : > { %2494 = vmatprep.subr.mxu0 %v2788_v0 }
 0x746   : > { %2492 = vmatmul.mubr.msk.f32.vlgmr.msra.gmra.mxu0 %vm464_vm1, %v1710_v34 }
 0x747   : > { %2495 = vmatpush3.xpose.msk.msra.mxu0 %vm464_vm1, %v1790_v35  ;;  %2496 = vmatprep.mubr.msk.f32.mxu0 %vm2789_vm0, %v2788_v0 }
 0x748   : > { %2504 = vmatprep.subr.mxu0 %v2788_v0 }
 0x74a   : > { %2497 = vmatmul.mubr.msk.f32.vlgmr.msra.gmra.mxu0 %vm464_vm1, %v1788_v36 }
 0x74b   : > { %2506 = vmatprep.mubr.msk.f32.mxu0 %vm2789_vm0, %v2788_v0 }
 0x76a   : > { %v1450_v37 = vpop.xlane.xlu0 %1449 }
 0x76b   : > { %v1454_v38 = vsub.f32 %v1367_v25, %v1450_v37 }
 0x76d   : > { %v1456_v39 = vmul.f32 1.442695, %v1454_v38 }
 0x76e   : > { %v1471_v40 = vpop.permute.xlu0 %1470 }
 0x76f   : > { %2619 = vpow2.f32 %v1456_v39  ;;  %2469 = vmatpush3.msra.mxu1 %v1471_v40 }
 0x770   : > { %2478 = vmatprep.subr.mxu1 %v1625_v63 }
 0x772   : > { %v1888_v16 = vpop.permute.xlu0 %1887 }
 0x77c   : > { %v2620_v41 = vpop.eup %2619 }
 0x77d   : > { %v1460_v42 = vsel %vm617_vm3, %v2620_v41, 0.0 }
 0x77e   : > { %1461 = vadd.xlane.f32.xlu1 %v1460_v42 }
 0x7c8   : > { %v2457_v45 = vpop.f32.mrf.mxu1 }
 0x7c9   : > { %v3132_v46 = vadd.f32 %v2457_v45, %v872_v44 }
 0x7ca   : > { %v1281_v14 = vpop.f32.mrf.mxu1 }
 0x7cb   : > { %v1290_v34 = vadd.f32 %v1281_v14, %v871_v33 }
 0x802   : > { %v1618_v47 = vpop.f32.mrf.mxu0 }
 0x804   : > { %v2477_v48 = vpop.f32.mrf.mxu0 }
 0x806   : > { %v1783_v49 = vpop.f32.mrf.mxu0 }
 0x807   : > { %v1784_v50 = vadd.f32 %v1783_v49, %v3020_v2  ;;  %v1462_v51 = vpop.xlane.xlu1 %1461 }
 0x808   : > { %2621 = vrcp.f32 %v1462_v51  ;;  %v2493_v54 = vpop.f32.mrf.mxu0 }
 0x809   : > { %v1865_v59 = vsel %vm617_vm3, %v1784_v50, -inf }
 0x80a   : > { %1866 = vmax.xlane.f32.xlu1 %v1865_v59  ;;  %v1861_v52 = vpop.f32.mrf.mxu0 }
 0x80b   : > { %v1862_v53 = vadd.f32 %v1861_v52, %v3020_v2 }
 0x80c   : > { %v2498_v56 = vpop.f32.mrf.mxu0 }
 0x80d   : > { %v1868_v60 = vsel %vm617_vm3, %v1862_v53, -inf }
 0x80e   : > { %1869 = vmax.xlane.f32.xlu1 %v1868_v60 }
 0x815   : > { %v2622_v61 = vpop.eup %2621 }
 0x816   : > { %v1468_v62 = vmul.f32 %v2622_v61, %v2620_v41 }
 0x818   : > { %2471 = vmatmul.mubr.msk.f32.vlgmr.msra.gmra.mxu1 %vm617_vm3, %v1468_v62 }
 0x819   : > { %2479 = vmatpush3.msra.mxu1 %v1625_v63 }
 0x81a   : > { %2480 = vmatprep.subr.mxu1 %v1624_v1 }
 0x81b   : > { %2481 = vmatpush3.msra.mxu1 %v1624_v1 }
 0x81c   : > { %2482 = vmatprep.subr.mxu1 %v1623_v3 }
 0x81d   : > { %2483 = vmatpush3.msra.mxu1 %v1623_v3 }
 0x81e   : > { %2484 = vmatprep.subr.mxu1 %v1622_v4 }
 0x81f   : > { %2485 = vmatpush3.msra.mxu1 %v1622_v4 }
 0x820   : > { %2499 = vmatprep.subr.mxu1 %v2788_v0 }
 0x893   : > { %v1867_v2 = vpop.xlane.xlu1 %1866 }
 0x894   : > { %v1871_v5 = vsub.f32 %v1784_v50, %v1867_v2 }
 0x896   : > { %v1873_v6 = vmul.f32 1.442695, %v1871_v5 }
 0x897   : > { %v1870_v7 = vpop.xlane.xlu1 %1869 }
 0x898   : > { %2623 = vpow2.f32 %v1873_v6  ;;  %v1872_v8 = vsub.f32 %v1862_v53, %v1870_v7 }
 0x89a   : > { %v1875_v9 = vmul.f32 1.442695, %v1872_v8 }
 0x89c   : > { %2625 = vpow2.f32 %v1875_v9 }
 0x8a5   : > { %v2624_v10 = vpop.eup %2623 }
 0x8a6   : > { %v1877_v11 = vsel %vm617_vm3, %v2624_v10, 0.0 }
 0x8a7   : > { %1878 = vadd.xlane.f32.xlu1 %v1877_v11 }
 0x8a9   : > { %v2626_v12 = vpop.eup %2625 }
 0x8aa   : > { %v1880_v13 = vsel %vm617_vm3, %v2626_v12, 0.0 }
 0x8ab   : > { %1881 = vadd.xlane.f32.xlu1 %v1880_v13 }
 0x8bc   : > { %1963 = vrot.lane.b32.xlu1 %v3013_v57, %s2793_s9 }
 0x8d8   : > { %v1542_v15 = vpop.f32.mrf.mxu1 }
 0x8d9   : > { %2486 = vmatprep.mubr.msk.f32.mxu1 %vm464_vm1, %v1542_v15 }
 0x8da   : > { %v2472_v17 = vpop.f32.mrf.mxu1  ;;  %2487 = vmatmul.mubr.msk.f32.vlgmr.msra.gmra.mxu1 %vm464_vm1, %v1618_v47 }
 0x8db   : > { %2500 = vmatpush3.msra.mxu1 %v1888_v16  ;;  %2501 = vmatprep.mubr.msk.f32.mxu1 %vm2789_vm0, %v2788_v0  ;;  %v2040_v0 = vld [vmem:[#allocation7 + $0x68] sm:$0xff] }
 0x8dc   : > { %2509 = vmatprep.subr.mxu1 %v2042_v18 }
 0x930   : > { %v1879_v20 = vpop.xlane.xlu1 %1878 }
 0x931   : > { %2627 = vrcp.f32 %v1879_v20 }
 0x934   : > { %v1882_v19 = vpop.xlane.xlu1 %1881 }
 0x935   : > { %2629 = vrcp.f32 %v1882_v19 }
 0x938   : > { %v1964_v21 = vpop.permute.xlu1 %1963 }
 0x939   : > { %2505 = vmatpush3.msra.mxu0 %v1964_v21 }
 0x93e   : > { %v2628_v57 = vpop.eup %2627 }
 0x93f   : > { %v1885_v22 = vmul.f32 %v2628_v57, %v2624_v10 }
 0x941   : > { %2502 = vmatmul.mubr.msk.f32.vlgmr.msra.gmra.mxu1 %vm617_vm3, %v1885_v22 }
 0x942   : > { %v2630_v24 = vpop.eup %2629  ;;  %2510 = vmatpush3.msra.mxu1 %v2042_v18 }
 0x943   : > { %v1886_v25 = vmul.f32 %v2630_v24, %v2626_v12  ;;  %2511 = vmatprep.subr.mxu1 %v2041_v23 }
 0x944   : > { %2512 = vmatpush3.msra.mxu1 %v2041_v23 }
 0x945   : > { %2507 = vmatmul.mubr.msk.f32.vlgmr.msra.gmra.mxu0 %vm617_vm3, %v1886_v25  ;;  %2513 = vmatprep.subr.mxu1 %v2040_v0 }
 0x946   : > { %2514 = vmatpush3.msra.mxu1 %v2040_v0 }
 0x947   : > { %2515 = vmatprep.subr.mxu1 %v2039_v26 }
 0x948   : > { %2516 = vmatpush3.msra.mxu1 %v2039_v26 }
 0x99a   : > { %v2488_v27 = vpop.f32.mrf.mxu1 }
 0x99b   : > { %v1708_v29 = vadd.f32 %v2488_v27, %v3132_v46 }
 0x99c   : > { %v1698_v30 = vpop.f32.mrf.mxu1 }
 0x99d   : > { %v1707_v36 = vadd.f32 %v1698_v30, %v1290_v34 }
 0xa01   : > { %v1959_v55 = vpop.f32.mrf.mxu1 }
 0xa02   : > { %2517 = vmatprep.mubr.msk.f32.mxu1 %vm464_vm1, %v1959_v55 }
 0xa03   : > { %v2503_v31 = vpop.f32.mrf.mxu1 }
 0xa05   : > { %v2035_v32 = vpop.f32.mrf.mxu0 }
 0xa06   : > { %2518 = vmatmul.mubr.msk.f32.vlgmr.msra.gmra.mxu1 %vm464_vm1, %v2035_v32 }
 0xa07   : > { %v2508_v58 = vpop.f32.mrf.mxu0 }
 0xac6   : > { %v2519_v35 = vpop.f32.mrf.mxu1 }
 0xac7   : > { %v2125_v37 = vadd.f32 %v2519_v35, %v1708_v29 }
 0xac8   : > { %v2115_v38 = vpop.f32.mrf.mxu1 }
 0xac9   : > { %2127 = vst [vmem:[%s244_s7 + $0x8] sm:$0xff] %v2125_v37  ;;  %v2124_v28 = vadd.f32 %v2115_v38, %v1707_v36 }
 0xacb   : > { %2126 = vst [vmem:[%s244_s7] sm:$0xff] %v2124_v28 }
 0xacc   : > { %2724 = shalt.err (!%p2721_p9)
}
 0xacd   : > { %s2725_s8 = scalar_lea.hbm %s3163_s30, 256  ;;  %s2729_s9 = scalar_lea.hbm %s3210_s4, 512 }
 0xace   : > { %p2726_p13 = scmp.ne.s32.totalorder %s3163_s30, %s2725_s8  ;;  %p2730_p4 = scmp.lt.s32.totalorder %s3163_s30, %s3210_s4 }
 0xacf   : > { %p2731_p8 = scmp.lt.s32.totalorder %s2729_s9, %s2725_s8 }
 0xad0   : > { %p2727_p5 = pnand %p2726_p13, %p3226_p10 }
 0xad1   : > { %p2732_p7 = por %p2731_p8, %p2730_p4 }
 0xad2   : > { %p2728_p0 = pneg %p2727_p5 }
 0xad4   : > { %p2733_p11 = pnand %p2732_p7, %p2728_p0 }
 0xad6   : > { %2736 = shalt.err (!%p2733_p11)
}
 0xad7   : > { %s2795_s7 = smov 128   ;;  %s2796_s28 = smov 8  }
 0xad8   : > { %2530 = dma.vmem_to_hbm [thread:$0]  (%p3226_p10), %s3158_s11, 256, %s3163_s30, %s2129_s6, %s2795_s7, %s2795_s7, %s2796_s28  }
 0xad9 PF: > { %s2157_s29 = sand.u32 1, %s2767_s15   ;;  %p3227_p1 = scmp.ne.s32.totalorder %s3216_s22, 0 }
 0xada   : > { %p3228_p2 = scmp.ge.s32.totalorder %s2779_s18, 2  ;;  %s2158_s26 = scalar_lea.sflag [#allocation4], %s2157_s29 }
 0xadc   : > { %p2544_p6 = pnand %p3228_p2, %p3227_p1 }
 0xade   : > { %p2545_p12 = pneg %p2544_p6 }
 0xae0   : > { %2762 = dma.done.wait (%p2545_p12), %s2158_s26, 256  }
 0xae1   : > { %2764 = vsyncadd (%p2545_p12), %s2158_s26, 4294967040  ;;  %p18_p3 = scmp.ge.s32.totalorder %s2897_s13, 4   ;;  %s3229_s15 = smov %s2771_s16 }
 0xae2   : > { %s3230_s16 = smov %s2775_s17  ;;  %s3231_s17 = smov %s2906_s24 }
 0xae3   : > { %s3232_s18 = smov %s2897_s13  ;;  %20 = sbr.rel (!%p18_p3) target bundleno = 6 (0x6), region = 89 }
 0xae8   :  { %2163 = vsyncpa [#allocation3], 1 }
 0xae9   :  { %2165 = vsyncpa [#allocation3 + $0x1], 1 }
 0xaea   :  { %2166 = vsyncpa [#allocation6], 1 }
 0xaeb   :  { %2167 = vsyncpa [#allocation4], 1 }
 0xaec   :  { %2169 = vsyncpa [#allocation4 + $0x1], 1 }

</bundles_post_ra>
